<compile_context>
chip_gen: v7x
topology: tpu7x:2x2x1
jax: 0.10.0
libtpu: 0.0.40
codegen_flags: <defaults>
</compile_context>

<pallas_src>
import functools

import jax
import jax.numpy as jnp
from jax.experimental import pallas as pl
from jax.experimental.pallas import tpu as pltpu


# ------------------------------- Pallas kernel ------------------------------

def _linear_average_kernel(x_ref, mem_ref, o_ref, acc_ref, *, inv_t):
    """One (tm x tn) output tile, accumulated over the K grid axis.

    x_ref:   [tm, tk]   activations tile
    mem_ref: [tn, tk]   memory-bank tile (row-major [N, K]; contraction on K)
    o_ref:   [tm, tn]   output tile
    acc_ref: [tm, tn]   f32 accumulator scratch (persists across K steps)
    """
    k = pl.program_id(2)

    @pl.when(k == 0)
    def _():
        acc_ref[...] = jnp.zeros_like(acc_ref)

    # x @ memory.T for this tile: contract the last dim of both operands.
    acc_ref[...] += jax.lax.dot_general(
        x_ref[...], mem_ref[...],
        dimension_numbers=(((1,), (1,)), ((), ())),
        preferred_element_type=jnp.float32,
    )

    @pl.when(k == pl.num_programs(2) - 1)
    def _():
        # Scale by 1/T once, in the finalize branch (hoisted out of the K loop).
        o_ref[...] = (acc_ref[...] * inv_t).astype(o_ref.dtype)


# --------------------------------- wrapper ----------------------------------

def _round_up(a, m):
    return pl.cdiv(a, m) * m


def linear_average_forward(x, y, memory, *, T=0.05, tm=None, tn=None, tk=None):
    """out = (x.float() @ memory.T) / T.  `y` is unused (matches the torch forward)."""
    del y  # unused by LinearAverage.forward
    x = x.astype(jnp.float32)          # x.float()
    memory = memory.astype(jnp.float32)

    M, K = x.shape
    N, K2 = memory.shape
    assert K == K2, (x.shape, memory.shape)

    # Tile sizes: sublane-aligned M tile, 128-aligned lane tiles (N, K).
    tm = tm if tm is not None else min(256, _round_up(M, 8))
    tn = tn if tn is not None else min(256, _round_up(N, 128))
    tk = tk if tk is not None else min(512, _round_up(K, 128))

    Mp, Np, Kp = _round_up(M, tm), _round_up(N, tn), _round_up(K, tk)
    if (Mp, Kp) != (M, K):
        x = jnp.pad(x, ((0, Mp - M), (0, Kp - K)))
    if (Np, Kp) != (N, K):
        memory = jnp.pad(memory, ((0, Np - N), (0, Kp - K)))

    grid = (Mp // tm, Np // tn, Kp // tk)
    kern = functools.partial(_linear_average_kernel, inv_t=float(1.0 / T))

    out = pl.pallas_call(
        kern,
        out_shape=jax.ShapeDtypeStruct((Mp, Np), jnp.float32),
        grid=grid,
        in_specs=[
            pl.BlockSpec((tm, tk), lambda i, j, k: (i, k)),   # x tiles
            pl.BlockSpec((tn, tk), lambda i, j, k: (j, k)),   # memory tiles
        ],
        out_specs=pl.BlockSpec((tm, tn), lambda i, j, k: (i, j)),
        scratch_shapes=[pltpu.VMEM((tm, tn), jnp.float32)],
        compiler_params=pltpu.CompilerParams(
            dimension_semantics=("parallel", "parallel", "arbitrary"),
            # Tile footprint (double-buffered ins + out + acc) is ~2.5 MiB at
            # the default tiles; 32 MiB leaves ample headroom on v5e/v6e/v7x.
            vmem_limit_bytes=32 * 1024 * 1024,
        ),
    )(x, memory)

    return out[:M, :N]


# ----------------------------------- main -----------------------------------

if __name__ == "__main__":
    key = jax.random.PRNGKey(0)
    kx, km, ky = jax.random.split(key, 3)

    batch, input_size, output_size = 16, 256, 512
    T = 0.05

    x = jax.random.normal(kx, (batch, input_size), dtype=jnp.float32)
    # The torch buffer starts as zeros; use an L2-normalized random memory
    # (what set_weight/update_weight would install) so the test is non-trivial.
    memory = jax.random.normal(km, (output_size, input_size), dtype=jnp.float32)
    memory = memory / jnp.linalg.norm(memory, axis=1, keepdims=True)
    y = jax.random.randint(ky, (batch,), 0, output_size)  # unused by forward

    fwd = jax.jit(lambda x_, y_, m_: linear_average_forward(x_, y_, m_, T=T))
    out = fwd(x, y, memory)
    jax.block_until_ready(out)

    ref = (x @ memory.T) / T
    assert out.shape == (batch, output_size), out.shape
    assert jnp.allclose(out, ref, rtol=1e-5, atol=1e-4)

    # TODO(synk): update_weight / set_weight mutate the memory buffer between
    # steps; that stateful bookkeeping stays in the host-side wrapper (it is
    # not part of forward()).
    print("KERNEL_OK")
</pallas_src>

<mosaic_0001>
module attributes {stable_mosaic.version = 11 : i64} {
  func.func @_linear_average_kernel(%arg0: i32, %arg1: i32, %arg2: i32, %arg3: memref<16x256xf32, #tpu.memory_space<vmem>>, %arg4: memref<256x256xf32, #tpu.memory_space<vmem>>, %arg5: memref<16x256xf32, #tpu.memory_space<vmem>>, %arg6: memref<16x256xf32, #tpu.memory_space<vmem>>) attributes {dimension_semantics = [#tpu.dimension_semantics<parallel>, #tpu.dimension_semantics<parallel>, #tpu.dimension_semantics<arbitrary>], iteration_bounds = array<i64: 1, 2, 1>, scalar_prefetch = 0 : i64, scratch_operands = 1 : i64, tpu.core_type = #tpu.core_type<tc>, window_params = [{transform_indices = @transform_0, window_bounds = array<i64: 16, 256>}, {transform_indices = @transform_1, window_bounds = array<i64: 256, 256>}, {transform_indices = @transform_2, window_bounds = array<i64: 16, 256>}]} {
    %c0_i32 = arith.constant 0 : i32
    %0 = arith.cmpi eq, %arg2, %c0_i32 : i32
    %1 = arith.extui %0 : i1 to i32
    %c0_i32_0 = arith.constant 0 : i32
    %2 = arith.cmpi ne, %1, %c0_i32_0 : i32
    scf.if %2 {
      %cst_10 = arith.constant 0.000000e+00 : f32
      %12 = vector.broadcast %cst_10 : f32 to vector<16x256xf32>
      %c0_11 = arith.constant 0 : index
      %c0_12 = arith.constant 0 : index
      %13 = vector.load %arg6[%c0_11, %c0_12] : memref<16x256xf32, #tpu.memory_space<vmem>>, vector<16x256xf32>
      tpu.vector_store %arg6[%c0_11, %c0_12], %12 {strides = array<i32>} : memref<16x256xf32, #tpu.memory_space<vmem>>, vector<16x256xf32>,
    } else {
    }
    %c0 = arith.constant 0 : index
    %c0_1 = arith.constant 0 : index
    %3 = vector.load %arg6[%c0, %c0_1] : memref<16x256xf32, #tpu.memory_space<vmem>>, vector<16x256xf32>
    %c0_2 = arith.constant 0 : index
    %c0_3 = arith.constant 0 : index
    %4 = vector.load %arg3[%c0_2, %c0_3] : memref<16x256xf32, #tpu.memory_space<vmem>>, vector<16x256xf32>
    %c0_4 = arith.constant 0 : index
    %c0_5 = arith.constant 0 : index
    %5 = vector.load %arg4[%c0_4, %c0_5] : memref<256x256xf32, #tpu.memory_space<vmem>>, vector<256x256xf32>
    %cst = arith.constant dense<0.000000e+00> : vector<16x256xf32>
    %6 = tpu.matmul %4, %5, %cst {dimension_numbers = #tpu.dot_dimension_numbers<[1], [1], [0], [0], [0, 0, 1, 0], [], []>} : vector<16x256xf32>, vector<256x256xf32>, vector<16x256xf32> -> vector<16x256xf32>
    %7 = arith.addf %3, %6 : vector<16x256xf32>
    %c0_6 = arith.constant 0 : index
    %c0_7 = arith.constant 0 : index
    %8 = vector.load %arg6[%c0_6, %c0_7] : memref<16x256xf32, #tpu.memory_space<vmem>>, vector<16x256xf32>
    tpu.vector_store %arg6[%c0_6, %c0_7], %7 {strides = array<i32>} : memref<16x256xf32, #tpu.memory_space<vmem>>, vector<16x256xf32>,
    %c0_i32_8 = arith.constant 0 : i32
    %9 = arith.cmpi eq, %arg2, %c0_i32_8 : i32
    %10 = arith.extui %9 : i1 to i32
    %c0_i32_9 = arith.constant 0 : i32
    %11 = arith.cmpi ne, %10, %c0_i32_9 : i32
    scf.if %11 {
      %c0_10 = arith.constant 0 : index
      %c0_11 = arith.constant 0 : index
      %12 = vector.load %arg6[%c0_10, %c0_11] : memref<16x256xf32, #tpu.memory_space<vmem>>, vector<16x256xf32>
      %cst_12 = arith.constant 2.000000e+01 : f32
      %13 = vector.broadcast %cst_12 : f32 to vector<16x256xf32>
      %14 = arith.mulf %12, %13 : vector<16x256xf32>
      %c0_13 = arith.constant 0 : index
      %c0_14 = arith.constant 0 : index
      %15 = vector.load %arg5[%c0_13, %c0_14] : memref<16x256xf32, #tpu.memory_space<vmem>>, vector<16x256xf32>
      tpu.vector_store %arg5[%c0_13, %c0_14], %14 {strides = array<i32>} : memref<16x256xf32, #tpu.memory_space<vmem>>, vector<16x256xf32>,
    } else {
    }
    return
  }
  func.func @transform_0(%arg0: i32, %arg1: i32, %arg2: i32) -> (i32, i32) {
    %c0_i32 = arith.constant 0 : i32
    return %arg0, %arg2 : i32, i32
  }
  func.func @transform_1(%arg0: i32, %arg1: i32, %arg2: i32) -> (i32, i32) {
    %c0_i32 = arith.constant 0 : i32
    return %arg1, %arg2 : i32, i32
  }
  func.func @transform_2(%arg0: i32, %arg1: i32, %arg2: i32) -> (i32, i32) {
    %c0_i32 = arith.constant 0 : i32
    return %arg0, %arg1 : i32, i32
  }
}

</mosaic_0001>

<bundles_post_ra>
// kernel: _lambda_.1
= control target key start
LH: loop header
LB: loop body
LE: loop exit
PB: predicated region body
PF: predicated region fallthrough
CT: control target
= control target key end

     0   :  { %7 = vsyncpa [#allocation4], 0  ;;  %s1182_s0 = inlined_call_operand.hbm [shape: f32[16,256], index: 0, kind: input, shape index: {}]   ;;  %s1183_s1 = inlined_call_operand.hbm [shape: f32[512,256], index: 1, kind: input, shape index: {}]   ;;  %s1184_s2 = inlined_call_operand.hbm [shape: f32[16,512], index: 2, kind: output, shape index: {}]  }
   0x1   :  { %8 = vsyncpa [#allocation7], 0 }
   0x2   :  { %10 = vsyncpa [#allocation7 + $0x1], 0 }
   0x3   :  { %11 = vsyncpa [#allocation5], 0 }
   0x4   :  { %13 = vsyncpa [#allocation5 + $0x1], 0  ;;  %s890_s9 = smov 0   ;;  %s892_s10 = smov 0  }
   0x5   :  { %s894_s11 = smov 0   ;;  %s896_s12 = smov 0  }
   0x6   :  { %s898_s13 = smov 0   ;;  %s900_s14 = smov 0  }
   0x7 LB: > { %s526_s15 = sadd.s32 4294967295, %s865_s14   ;;  %s527_s16 = sadd.s32 4294967294, %s865_s14   ;;  %s865_s14 = sphi %s900_s14, %s19_s14   ;;  %s861_s13 = sphi %s898_s13, %s1208_s13   ;;  %s857_s12 = sphi %s896_s12, %s1207_s12   ;;  %s853_s11 = sphi %s894_s11, %s1206_s11   ;;  %s849_s10 = sphi %s892_s10, %s1205_s10   ;;  %s845_s9 = sphi %s890_s9, %s1204_s9  }
   0x8   : > { %p88_p0 = scmp.ne.s32.totalorder %s849_s10, %s845_s9  ;;  %p924_p1 = scmp.eq.s32.totalorder %s526_s15, 0 }
   0x9   : > { %p928_p2 = scmp.eq.s32.totalorder %s526_s15, 1  ;;  %p120_p3 = scmp.eq.s32.totalorder %s527_s16, 1 }
   0xa   : > { %s1189_s17 = scalar_select %p924_p1, 1, 0 }
   0xb   : > { %s1190_s18 = scalar_select %p928_p2, 1, 0 }
   0xc   : > { %p934_p4 = por %p924_p1, %p88_p0  ;;  %p528_p5 = scmp.ge.s32.totalorder %s865_s14, 1 }
   0xd   : > { %p939_p6 = por %p120_p3, %p88_p0  ;;  %p127_p7 = scmp.lt.s32.totalorder %s865_s14, 3 }
   0xe   : > { %s1191_s19 = scalar_select %p934_p4, 1, 0 }
   0xf   : > { %s1192_s20 = scalar_select %p939_p6, 1, 0 }
  0x10   : > { %p944_p8 = pnand %p528_p5, %p127_p7  ;;  %s867_s22 = smov [#allocation3]  }
  0x11   : > { %s145_s23 = sshll.u32 %s867_s22, 4  ;;  %s34_s25 = sadd.s32 1, %s861_s13  ;;  %s146_s23 = int_to_ptr.vmem [resolvable:$true] %s145_s23 }
  0x12   : > { %s1193_s21 = scalar_select %p944_p8, 1, 0 }
  0x13   : > { %p651_p9 = pneg %p944_p8  ;;  %s721_s28 = scalar_lea.hbm %s1182_s0, 512 }
  0x14   : > { %p722_p12 = scmp.ne.s32.totalorder %s1182_s0, %s721_s28  ;;  %p728_p5 = scmp.lt.u32.totalorder %s721_s28, %s1182_s0 }
  0x15   : > { %p953_p11 = pnand %p651_p9, %p924_p1 }
  0x17   : > { %p723_p13 = pneg %p953_p11 }
  0x19   : > { %p724_p0 = pnand %p723_p13, %p722_p12 }
  0x1b   : > { %p725_p3 = pneg %p724_p0 }
  0x1d   : > { %p730_p7 = pnand %p728_p5, %p725_p3 }
  0x1f   : > { %733 = shalt.err (!%p730_p7)
}
  0x20   : > { %s734_s5 = scalar_lea.vmem %s146_s23, 512  ;;  %p742_p4 = scmp.lt.s32.totalorder %s146_s23, %s146_s23 }
  0x21   : > { %p735_p9 = scmp.ne.s32.totalorder %s146_s23, %s734_s5  ;;  %p743_p1 = scmp.lt.s32.totalorder %s734_s5, %s734_s5 }
  0x23   : > { %p737_p10 = pnand %p735_p9, %p723_p13  ;;  %p744_p8 = por %p743_p1, %p742_p4 }
  0x25   : > { %p738_p6 = pneg %p737_p10 }
  0x27   : > { %p745_p2 = pnand %p744_p8, %p738_p6 }
  0x29   : > { %748 = shalt.err (!%p745_p2)
}
  0x2a   : > { %s868_s6 = smov 256   ;;  %s869_s7 = smov 16  }
  0x2b   : > { %654 = dma.hbm_to_vmem [thread:$0]  (!%p953_p11), %s1182_s0, 512, %s146_s23, [#allocation4], %s868_s6, %s868_s6, %s869_s7  }
  0x2c   : > { %p36_p1 = scmp.ge.s32.totalorder %s34_s25, 2  ;;  %s75_s16 = sadd.s32 1, %s853_s11 }
  0x2d   : > { %p82_p2 = scmp.ne.s32.totalorder %s853_s11, %s849_s10  ;;  %p83_p4 = scmp.eq.s32.totalorder %s865_s14, 0 }
  0x2e   : > { %s1210_s25 = smov (%p36_p1, %s34_s25), 0  ;;  %p1196_p8 = scmp.ne.s32.totalorder %s1190_s18, 0 }
  0x2f   : > { %p983_p6 = por %p83_p4, %p82_p2  ;;  %s70_s26 = ssub.s32 %s861_s13, %s1210_s25 }
  0x30   : > { %p989_p10 = por %p1196_p8, %p82_p2  ;;  %p664_p12 = scmp.lt.s32.totalorder %s865_s14, 2 }
  0x31   : > { %p73_p11 = scmp.eq.s32.totalorder %s70_s26, 0  ;;  %s159_s23 = sand.u32 1, %s853_s11  }
  0x32   : > { %s531_s27 = sshll.u32 %s159_s23, 9  ;;  %s545_s29 = sshll.u32 %s861_s13, 13 }
  0x33   : > { %s998_s28 = scalar_select %p73_p11, %s853_s11, %s75_s16  }
  0x34   : > { %s1004_s4 = scalar_lea.hbm %s1183_s1, %s545_s29  ;;  %s163_s18 = scalar_lea.vmem [#allocation6], %s531_s27 }
  0x35   : > { %s173_s5 = sshll.u32 %s163_s18, 4  ;;  %p1010_p13 = pnand %p664_p12, %p983_p6  ;;  %s1006_s5 = int_to_ptr.vmem [resolvable:$true] %s173_s5 }
  0x36   : > { %s1014_s15 = scalar_lea.sflag [#allocation7], %s159_s23  ;;  %s749_s16 = scalar_lea.hbm %s1004_s4, 8192 }
  0x37   : > { %p750_p0 = scmp.ne.s32.totalorder %s1004_s4, %s749_s16  ;;  %p751_p3 = pneg %p1010_p13 }
  0x38   : > { %s754_s22 = scalar_lea.hbm %s1183_s1, 16384  ;;  %p755_p9 = scmp.lt.u32.totalorder %s1004_s4, %s1183_s1 }
  0x39   : > { %p752_p5 = pnand %p751_p3, %p750_p0  ;;  %p756_p1 = scmp.lt.u32.totalorder %s754_s22, %s749_s16 }
  0x3a   : > { %p758_p4 = scmp.lt.u32.totalorder %s749_s16, %s1004_s4 }
  0x3b   : > { %p753_p7 = pneg %p752_p5  ;;  %p757_p2 = por %p756_p1, %p755_p9 }
  0x3d   : > { %p759_p6 = por %p758_p4, %p757_p2 }
  0x3f   : > { %p760_p8 = pnand %p759_p6, %p753_p7 }
  0x41   : > { %763 = shalt.err (!%p760_p8)
}
  0x42   : > { %s764_s23 = scalar_lea.vmem %s1006_s5, 8192  ;;  %s870_s3 = smov [#allocation6]  }
  0x43   : > { %p765_p12 = scmp.ne.s32.totalorder %s1006_s5, %s764_s23  ;;  %s769_s18 = sshll.u32 %s870_s3, 4  ;;  %s770_s18 = int_to_ptr.vmem [resolvable:$false] %s769_s18 }
  0x44   : > { %s771_s26 = scalar_lea.vmem %s770_s18, 16384  ;;  %p772_p5 = scmp.lt.s32.totalorder %s1006_s5, %s770_s18 }
  0x45   : > { %p767_p11 = pnand %p765_p12, %p751_p3  ;;  %p773_p9 = scmp.lt.s32.totalorder %s771_s26, %s764_s23 }
  0x47   : > { %p768_p0 = pneg %p767_p11  ;;  %p774_p1 = por %p773_p9, %p772_p5 }
  0x49   : > { %p775_p2 = pnand %p774_p1, %p768_p0 }
  0x4b   : > { %778 = shalt.err (!%p775_p2)
}
  0x4c   : > { %658 = dma.hbm_to_vmem [thread:$0]  (!%p1010_p13), %s1004_s4, 8192, %s1006_s5, %s1014_s15, %s868_s6, %s868_s6, %s869_s7  }
  0x4d   : > { %p1199_p3 = scmp.ne.s32.totalorder %s1193_s21, 0 }
  0x4e   : > { %p1200_p7 = scmp.ne.s32.totalorder (!%p1199_p3), %s1189_s17, 0 }
  0x4f   : > { %185 = sbr.rel (%p1199_p3) target bundleno = 453 (0x1c5), region = 28 }
  0x56   : > { %832 = dma.done.wait (%p1200_p7), [#allocation4], 512  }
  0x57   : > { %834 = vsyncadd (%p1200_p7), [#allocation4], 4294966784  ;;  %s1052_s16 = sand.u32 1, %s849_s10   ;;  %p1201_p13 = scmp.ne.s32.totalorder %s1191_s19, 0 }
  0x58   : > { %s537_s8 = sshll.u32 %s1052_s16, 9  ;;  %s192_s27 = scalar_lea.sflag [#allocation7], %s1052_s16 }
  0x59   : > { %s1056_s22 = scalar_lea.vmem [#allocation6], %s537_s8 }
  0x5a   : > { %836 = dma.done.wait (%p1201_p13), %s192_s27, 8192  }
  0x5b   : > { %838 = vsyncadd (%p1201_p13), %s192_s27, 4294959104  ;;  %v239_v0 = vld [vmem:[%s1056_s22 + $0x8] sm:$0xff]  ;;  %v241_v1 = vld [vmem:[%s1056_s22 + $0x18] sm:$0xff]  ;;  %s538_s17 = sshll.u32 %s1052_s16, 5  ;;  %s546_s6 = sshll.u32 %s857_s12, 8 }
  0x5c   : > { %v238_v2 = vld [vmem:[%s1056_s22] sm:$0xff]  ;;  %v547_v3 = vpack.c.bf16 %v241_v1, %v239_v0  ;;  %v240_v4 = vld [vmem:[%s1056_s22 + $0x10] sm:$0xff]  ;;  %v243_v5 = vld [vmem:[%s1056_s22 + $0x28] sm:$0xff]  ;;  %s215_s19 = scalar_lea.vmem [#allocation8], %s538_s17  ;;  %s1133_s5 = scalar_lea.hbm %s1184_s2, %s546_s6 }
  0x5d   : > { %v245_v6 = vld [vmem:[%s1056_s22 + $0x38] sm:$0xff]  ;;  %v549_v7 = vpack.c.bf16 %v240_v4, %v238_v2  ;;  %v242_v9 = vld [vmem:[%s1056_s22 + $0x20] sm:$0xff]  ;;  %v244_v10 = vld [vmem:[%s1056_s22 + $0x30] sm:$0xff]  ;;  %s419_s21 = sshll.u32 %s215_s19, 4  ;;  %s403_s12 = scalar_lea.sflag [#allocation5], %s1052_s16  ;;  %s1128_s21 = int_to_ptr.vmem [resolvable:$true] %s419_s21 }
  0x5e   : > { %v551_v8 = vpack.c.bf16 %v245_v6, %v243_v5  ;;  %548 = vmatprep.subr.bf16.mxu0 %v547_v3  ;;  %611 = vmatprep.subr.bf16.mxu1 %v547_v3  ;;  %v247_v11 = vld [vmem:[%s1056_s22 + $0x48] sm:$0xff]  ;;  %v249_v12 = vld [vmem:[%s1056_s22 + $0x58] sm:$0xff]  ;;  %v553_v13 = vpack.c.bf16 %v244_v10, %v242_v9  ;;  %v246_v15 = vld [vmem:[%s1056_s22 + $0x40] sm:$0xff]  ;;  %s779_s15 = scalar_lea.vmem %s1128_s21, 512  ;;  %s871_s29 = smov [#allocation8]  }
  0x5f   : > { %550 = vmatpush1.bf16.xpose.msra.mxu0 %v549_v7  ;;  %627 = vmatpush1.bf16.xpose.msra.mxu1 %v549_v7  ;;  %v555_v14 = vpack.c.bf16 %v249_v12, %v247_v11  ;;  %v248_v16 = vld [vmem:[%s1056_s22 + $0x50] sm:$0xff]  ;;  %v251_v17 = vld [vmem:[%s1056_s22 + $0x68] sm:$0xff]  ;;  %v253_v18 = vld [vmem:[%s1056_s22 + $0x78] sm:$0xff]  ;;  %p780_p4 = scmp.ne.s32.totalorder %s1128_s21, %s779_s15  ;;  %s783_s30 = sshll.u32 %s871_s29, 4  ;;  %s784_s30 = int_to_ptr.vmem [resolvable:$false] %s783_s30 }
  0x60   : > { %552 = vmatprep.subr.bf16.mxu0 %v551_v8  ;;  %612 = vmatprep.subr.bf16.mxu1 %v551_v8  ;;  %v557_v19 = vpack.c.bf16 %v248_v16, %v246_v15  ;;  %v559_v20 = vpack.c.bf16 %v253_v18, %v251_v17  ;;  %v250_v21 = vld [vmem:[%s1056_s22 + $0x60] sm:$0xff]  ;;  %v252_v22 = vld [vmem:[%s1056_s22 + $0x70] sm:$0xff]  ;;  %v235_v23 = vld [vmem:[#allocation3 + $0x8] sm:$0xff]  ;;  %s785_s23 = scalar_lea.vmem %s784_s30, 1024  ;;  %p786_p12 = scmp.lt.s32.totalorder %s1128_s21, %s784_s30 }
  0x61   : > { %v237_v24 = vld [vmem:[#allocation3 + $0x18] sm:$0xff]  ;;  %v255_v25 = vld [vmem:[%s1056_s22 + $0x88] sm:$0xff]  ;;  %366 = vmatprep.mubr.f32.mxu0 %v235_v23  ;;  %v561_v27 = vpack.c.bf16 %v252_v22, %v250_v21  ;;  %v254_v29 = vld [vmem:[%s1056_s22 + $0x80] sm:$0xff]  ;;  %p781_p6 = pnand %p780_p4, %p989_p10  ;;  %p787_p11 = scmp.lt.s32.totalorder %s785_s23, %s779_s15 }
  0x62   : > { %v257_v26 = vld [vmem:[%s1056_s22 + $0x98] sm:$0xff]  ;;  %372 = vmatprep.mubr.f32.mxu1 %v237_v24  ;;  %v256_v30 = vld [vmem:[%s1056_s22 + $0x90] sm:$0xff]  ;;  %v259_v31 = vld [vmem:[%s1056_s22 + $0xa8] sm:$0xff] }
  0x63   : > { %v563_v28 = vpack.c.bf16 %v257_v26, %v255_v25  ;;  %v261_v32 = vld [vmem:[%s1056_s22 + $0xb8] sm:$0xff]  ;;  %v565_v33 = vpack.c.bf16 %v256_v30, %v254_v29  ;;  %v258_v35 = vld [vmem:[%s1056_s22 + $0xa0] sm:$0xff]  ;;  %v260_v36 = vld [vmem:[%s1056_s22 + $0xb0] sm:$0xff]  ;;  %p782_p8 = pneg %p781_p6  ;;  %p788_p0 = por %p787_p11, %p786_p12 }
  0x64   : > { %v567_v34 = vpack.c.bf16 %v261_v32, %v259_v31  ;;  %v263_v37 = vld [vmem:[%s1056_s22 + $0xc8] sm:$0xff]  ;;  %v265_v38 = vld [vmem:[%s1056_s22 + $0xd8] sm:$0xff]  ;;  %v569_v39 = vpack.c.bf16 %v260_v36, %v258_v35  ;;  %v262_v41 = vld [vmem:[%s1056_s22 + $0xc0] sm:$0xff] }
  0x65   : > { %v571_v40 = vpack.c.bf16 %v265_v38, %v263_v37  ;;  %v264_v42 = vld [vmem:[%s1056_s22 + $0xd0] sm:$0xff]  ;;  %v267_v43 = vld [vmem:[%s1056_s22 + $0xe8] sm:$0xff]  ;;  %v269_v44 = vld [vmem:[%s1056_s22 + $0xf8] sm:$0xff]  ;;  %p789_p5 = pnand %p788_p0, %p782_p8 }
  0x66   : > { %v573_v45 = vpack.c.bf16 %v264_v42, %v262_v41  ;;  %v575_v46 = vpack.c.bf16 %v269_v44, %v267_v43  ;;  %v266_v47 = vld [vmem:[%s1056_s22 + $0xe0] sm:$0xff]  ;;  %v268_v48 = vld [vmem:[%s1056_s22 + $0xf0] sm:$0xff]  ;;  %v271_v49 = vld [vmem:[%s1056_s22 + $0x108] sm:$0xff] }
  0x67   : > { %554 = vmatpush1.bf16.xpose.msra.mxu0 %v553_v13  ;;  %628 = vmatpush1.bf16.xpose.msra.mxu1 %v553_v13  ;;  %v273_v50 = vld [vmem:[%s1056_s22 + $0x118] sm:$0xff]  ;;  %v577_v51 = vpack.c.bf16 %v268_v48, %v266_v47  ;;  %v270_v53 = vld [vmem:[%s1056_s22 + $0x100] sm:$0xff]  ;;  %v272_v54 = vld [vmem:[%s1056_s22 + $0x110] sm:$0xff] }
  0x68   : > { %556 = vmatprep.subr.bf16.mxu0 %v555_v14  ;;  %613 = vmatprep.subr.bf16.mxu1 %v555_v14  ;;  %v579_v52 = vpack.c.bf16 %v273_v50, %v271_v49  ;;  %v275_v55 = vld [vmem:[%s1056_s22 + $0x128] sm:$0xff]  ;;  %v277_v56 = vld [vmem:[%s1056_s22 + $0x138] sm:$0xff]  ;;  %v581_v57 = vpack.c.bf16 %v272_v54, %v270_v53  ;;  %v274_v59 = vld [vmem:[%s1056_s22 + $0x120] sm:$0xff] }
  0x69   : > { %v583_v58 = vpack.c.bf16 %v277_v56, %v275_v55  ;;  %v276_v60 = vld [vmem:[%s1056_s22 + $0x130] sm:$0xff]  ;;  %v279_v61 = vld [vmem:[%s1056_s22 + $0x148] sm:$0xff]  ;;  %v281_v62 = vld [vmem:[%s1056_s22 + $0x158] sm:$0xff] }
  0x6a   : > { %v585_v63 = vpack.c.bf16 %v276_v60, %v274_v59  ;;  %v587_v0 = vpack.c.bf16 %v281_v62, %v279_v61  ;;  %v278_v1 = vld [vmem:[%s1056_s22 + $0x140] sm:$0xff]  ;;  %v280_v2 = vld [vmem:[%s1056_s22 + $0x150] sm:$0xff]  ;;  %v283_v3 = vld [vmem:[%s1056_s22 + $0x168] sm:$0xff] }
  0x6b   : > { %v285_v4 = vld [vmem:[%s1056_s22 + $0x178] sm:$0xff]  ;;  %v589_v5 = vpack.c.bf16 %v280_v2, %v278_v1  ;;  %v282_v7 = vld [vmem:[%s1056_s22 + $0x160] sm:$0xff]  ;;  %v284_v8 = vld [vmem:[%s1056_s22 + $0x170] sm:$0xff] }
  0x6c   : > { %v591_v6 = vpack.c.bf16 %v285_v4, %v283_v3  ;;  %v287_v9 = vld [vmem:[%s1056_s22 + $0x188] sm:$0xff]  ;;  %v289_v10 = vld [vmem:[%s1056_s22 + $0x198] sm:$0xff]  ;;  %v593_v11 = vpack.c.bf16 %v284_v8, %v282_v7  ;;  %v286_v13 = vld [vmem:[%s1056_s22 + $0x180] sm:$0xff] }
  0x6d   : > { %v595_v12 = vpack.c.bf16 %v289_v10, %v287_v9  ;;  %v288_v14 = vld [vmem:[%s1056_s22 + $0x190] sm:$0xff]  ;;  %v291_v15 = vld [vmem:[%s1056_s22 + $0x1a8] sm:$0xff]  ;;  %v293_v16 = vld [vmem:[%s1056_s22 + $0x1b8] sm:$0xff] }
  0x6e   : > { %v597_v17 = vpack.c.bf16 %v288_v14, %v286_v13  ;;  %v599_v18 = vpack.c.bf16 %v293_v16, %v291_v15  ;;  %v295_v21 = vld [vmem:[%s1056_s22 + $0x1c8] sm:$0xff]  ;;  %v297_v22 = vld [vmem:[%s1056_s22 + $0x1d8] sm:$0xff]  ;;  %v294_v25 = vld [vmem:[%s1056_s22 + $0x1c0] sm:$0xff] }
  0x6f   : > { %558 = vmatpush1.bf16.xpose.msra.mxu0 %v557_v19  ;;  %629 = vmatpush1.bf16.xpose.msra.mxu1 %v557_v19  ;;  %v290_v19 = vld [vmem:[%s1056_s22 + $0x1a0] sm:$0xff]  ;;  %v603_v24 = vpack.c.bf16 %v297_v22, %v295_v21  ;;  %v296_v26 = vld [vmem:[%s1056_s22 + $0x1d0] sm:$0xff] }
  0x70   : > { %560 = vmatprep.subr.bf16.mxu0 %v559_v20  ;;  %614 = vmatprep.subr.bf16.mxu1 %v559_v20  ;;  %v292_v20 = vld [vmem:[%s1056_s22 + $0x1b0] sm:$0xff]  ;;  %v605_v29 = vpack.c.bf16 %v296_v26, %v294_v25  ;;  %v298_v31 = vld [vmem:[%s1056_s22 + $0x1e0] sm:$0xff] }
  0x71   : > { %v601_v23 = vpack.c.bf16 %v292_v20, %v290_v19  ;;  %v300_v32 = vld [vmem:[%s1056_s22 + $0x1f0] sm:$0xff] }
  0x72   : > { %v236_v35 = vld [vmem:[#allocation3 + $0x10] sm:$0xff] }
  0x77   : > { %562 = vmatpush1.bf16.xpose.msra.mxu0 %v561_v27  ;;  %630 = vmatpush1.bf16.xpose.msra.mxu1 %v561_v27  ;;  %v299_v27 = vld [vmem:[%s1056_s22 + $0x1e8] sm:$0xff] }
  0x78   : > { %564 = vmatprep.subr.bf16.mxu0 %v563_v28  ;;  %615 = vmatprep.subr.bf16.mxu1 %v563_v28  ;;  %v301_v28 = vld [vmem:[%s1056_s22 + $0x1f8] sm:$0xff] }
  0x79   : > { %v607_v30 = vpack.c.bf16 %v301_v28, %v299_v27 }
  0x7f   : > { %566 = vmatpush1.bf16.xpose.msra.mxu0 %v565_v33  ;;  %631 = vmatpush1.bf16.xpose.msra.mxu1 %v565_v33  ;;  %v609_v33 = vpack.c.bf16 %v300_v32, %v298_v31 }
  0x80   : > { %568 = vmatprep.subr.bf16.mxu0 %v567_v34  ;;  %616 = vmatprep.subr.bf16.mxu1 %v567_v34  ;;  %v234_v34 = vld [vmem:[#allocation3] sm:$0xff] }
  0x87   : > { %570 = vmatpush1.bf16.xpose.msra.mxu0 %v569_v39  ;;  %632 = vmatpush1.bf16.xpose.msra.mxu1 %v569_v39 }
  0x88   : > { %572 = vmatprep.subr.bf16.mxu0 %v571_v40  ;;  %617 = vmatprep.subr.bf16.mxu1 %v571_v40 }
  0x8f   : > { %574 = vmatpush1.bf16.xpose.msra.mxu0 %v573_v45  ;;  %633 = vmatpush1.bf16.xpose.msra.mxu1 %v573_v45 }
  0x90   : > { %576 = vmatprep.subr.bf16.mxu0 %v575_v46  ;;  %618 = vmatprep.subr.bf16.mxu1 %v575_v46 }
  0x97   : > { %578 = vmatpush1.bf16.xpose.msra.mxu0 %v577_v51  ;;  %634 = vmatpush1.bf16.xpose.msra.mxu1 %v577_v51 }
  0x98   : > { %580 = vmatprep.subr.bf16.mxu0 %v579_v52  ;;  %619 = vmatprep.subr.bf16.mxu1 %v579_v52 }
  0x9f   : > { %582 = vmatpush1.bf16.xpose.msra.mxu0 %v581_v57  ;;  %635 = vmatpush1.bf16.xpose.msra.mxu1 %v581_v57 }
  0xa0   : > { %584 = vmatprep.subr.bf16.mxu0 %v583_v58  ;;  %620 = vmatprep.subr.bf16.mxu1 %v583_v58 }
  0xa7   : > { %586 = vmatpush1.bf16.xpose.msra.mxu0 %v585_v63  ;;  %636 = vmatpush1.bf16.xpose.msra.mxu1 %v585_v63 }
  0xa8   : > { %588 = vmatprep.subr.bf16.mxu0 %v587_v0  ;;  %621 = vmatprep.subr.bf16.mxu1 %v587_v0 }
  0xaf   : > { %590 = vmatpush1.bf16.xpose.msra.mxu0 %v589_v5  ;;  %637 = vmatpush1.bf16.xpose.msra.mxu1 %v589_v5 }
  0xb0   : > { %592 = vmatprep.subr.bf16.mxu0 %v591_v6  ;;  %622 = vmatprep.subr.bf16.mxu1 %v591_v6 }
  0xb7   : > { %594 = vmatpush1.bf16.xpose.msra.mxu0 %v593_v11  ;;  %638 = vmatpush1.bf16.xpose.msra.mxu1 %v593_v11 }
  0xb8   : > { %596 = vmatprep.subr.bf16.mxu0 %v595_v12  ;;  %623 = vmatprep.subr.bf16.mxu1 %v595_v12 }
  0xbf   : > { %598 = vmatpush1.bf16.xpose.msra.mxu0 %v597_v17  ;;  %639 = vmatpush1.bf16.xpose.msra.mxu1 %v597_v17 }
  0xc0   : > { %600 = vmatprep.subr.bf16.mxu0 %v599_v18  ;;  %624 = vmatprep.subr.bf16.mxu1 %v599_v18 }
  0xc7   : > { %602 = vmatpush1.bf16.xpose.msra.mxu0 %v601_v23  ;;  %640 = vmatpush1.bf16.xpose.msra.mxu1 %v601_v23 }
  0xc8   : > { %604 = vmatprep.subr.bf16.mxu0 %v603_v24  ;;  %625 = vmatprep.subr.bf16.mxu1 %v603_v24 }
  0xcf   : > { %606 = vmatpush1.bf16.xpose.msra.mxu0 %v605_v29  ;;  %641 = vmatpush1.bf16.xpose.msra.mxu1 %v605_v29 }
  0xd0   : > { %608 = vmatprep.subr.bf16.mxu0 %v607_v30  ;;  %626 = vmatprep.subr.bf16.mxu1 %v607_v30 }
  0xd7   : > { %610 = vmatpush1.bf16.xpose.msra.mxu0 %v609_v33  ;;  %642 = vmatpush1.bf16.xpose.msra.mxu1 %v609_v33 }
  0xde   : > { %367 = vmatmul.mubr.f32.vlgmr.msra.gmra.mrb[0].mxu0 %v234_v34  ;;  %373 = vmatmul.mubr.f32.vlgmr.msra.gmra.mrb[0].mxu1 %v236_v35 }
 0x1b1   : > { %v368_v36 = vpop.f32.mrb[0].mxu0  ;;  %v374_v37 = vpop.f32.mrb[0].mxu1 }
 0x1b2   : > { %v394_v38 = vmul.f32 20.0, %v368_v36  ;;  %v396_v39 = vmul.f32 20.0, %v374_v37  ;;  %v370_v40 = vpop.f32.mrb[1].mxu0  ;;  %v376_v41 = vpop.f32.mrb[1].mxu1 }
 0x1b3   : > { %v395_v42 = vmul.f32 20.0, %v370_v40  ;;  %v397_v43 = vmul.f32 20.0, %v376_v41 }
 0x1b4   : > { %398 = vst [vmem:[%s215_s19] sm:$0xff] %v394_v38  ;;  %400 = vst [vmem:[%s215_s19 + $0x10] sm:$0xff] %v396_v39 }
 0x1b5   : > { %399 = vst [vmem:[%s215_s19 + $0x8] sm:$0xff] %v395_v42  ;;  %401 = vst [vmem:[%s215_s19 + $0x18] sm:$0xff] %v397_v43 }
 0x1b6   : > { %792 = shalt.err (!%p789_p5)
}
 0x1b7   : > { %s793_s3 = scalar_lea.hbm %s1133_s5, 512  ;;  %s797_s8 = scalar_lea.hbm %s1184_s2, 1024 }
 0x1b8   : > { %p794_p9 = scmp.ne.s32.totalorder %s1133_s5, %s793_s3  ;;  %p798_p3 = scmp.lt.u32.totalorder %s1133_s5, %s1184_s2 }
 0x1b9   : > { %p799_p7 = scmp.lt.u32.totalorder %s797_s8, %s793_s3  ;;  %p801_p4 = scmp.lt.u32.totalorder %s793_s3, %s1133_s5 }
 0x1ba   : > { %p795_p1 = pnand %p794_p9, %p989_p10 }
 0x1bb   : > { %p800_p13 = por %p799_p7, %p798_p3 }
 0x1bc   : > { %p796_p2 = pneg %p795_p1 }
 0x1bd   : > { %p802_p6 = por %p801_p4, %p800_p13 }
 0x1bf   : > { %p803_p8 = pnand %p802_p6, %p796_p2 }
 0x1c1   : > { %806 = shalt.err (!%p803_p8)
}
 0x1c2   : > { %s872_s17 = smov 256   ;;  %s873_s19 = smov 512  }
 0x1c3   : > { %s874_s6 = smov 16  }
 0x1c4   : > { %649 = dma.vmem_to_hbm [thread:$0]  (%p989_p10), %s1128_s21, 512, %s1133_s5, %s403_s12, %s872_s17, %s873_s19, %s874_s6  }
 0x1c5 PF: > { %s434_s7 = sand.u32 1, %s845_s9   ;;  %p1202_p12 = scmp.ne.s32.totalorder %s1192_s20, 0 }
 0x1c6   : > { %p1203_p11 = scmp.ge.s32.totalorder %s865_s14, 2  ;;  %s435_s4 = scalar_lea.sflag [#allocation5], %s434_s7 }
 0x1c8   : > { %p660_p0 = pnand %p1203_p11, %p1202_p12 }
 0x1ca   : > { %840 = dma.done.wait (!%p660_p0), %s435_s4, 512  }
 0x1cb   : > { %842 = vsyncadd (!%p660_p0), %s435_s4, 4294966784  ;;  %s19_s14 = sadd.s32 1, %s865_s14   ;;  %s1204_s9 = smov %s849_s10 }
 0x1cc   : > { %p16_p5 = scmp.ge.s32.totalorder %s19_s14, 4   ;;  %s1205_s10 = smov %s853_s11 }
 0x1cd   : > { %s1206_s11 = smov %s998_s28  ;;  %s1207_s12 = smov %s861_s13 }
 0x1ce   : > { %s1208_s13 = smov %s1210_s25  ;;  %18 = sbr.rel (!%p16_p5) target bundleno = 7 (0x7), region = 87 }
 0x1d5   :  { %440 = vsyncpa [#allocation4], 1 }
 0x1d6   :  { %442 = vsyncpa [#allocation4 + $0x1], 1 }
 0x1d7   :  { %443 = vsyncpa [#allocation7], 1 }
 0x1d8   :  { %445 = vsyncpa [#allocation7 + $0x1], 1 }
 0x1d9   :  { %446 = vsyncpa [#allocation5], 1 }
 0x1da   :  { %448 = vsyncpa [#allocation5 + $0x1], 1 }

</bundles_post_ra>
